<compile_context>
chip_gen: v7x
topology: tpu7x:2x2x1
jax: 0.10.0
libtpu: 0.0.40
codegen_flags: <defaults>
</compile_context>

<pallas_src>
import math
from functools import partial

import jax
import jax.numpy as jnp
from jax.experimental import pallas as pl
from jax.experimental.pallas import tpu as pltpu


# ----------------------------------------------------------------------------
# Pallas kernel: fused  out = x @ W_eff + bias   (K-reduction over grid axis 2)
# ----------------------------------------------------------------------------
def ttlora_linear_kernel(x_ref, w_ref, bias_ref, o_ref, acc_ref):
    k = pl.program_id(2)

    prod = jnp.dot(x_ref[...], w_ref[...], preferred_element_type=jnp.float32)

    @pl.when(k == 0)
    def _():
        # Direct write on the first K step: no zero-init + add pass over the
        # (TM, TN) f32 accumulator.
        acc_ref[...] = prod

    @pl.when(k > 0)
    def _():
        acc_ref[...] += prod

    @pl.when(k == pl.num_programs(2) - 1)
    def _():
        o_ref[...] = (acc_ref[...] + bias_ref[...].astype(jnp.float32)).astype(
            o_ref.dtype
        )


# ----------------------------------------------------------------------------
# Collapse the TT cores into an effective (in_features, out_features) matrix,
# with index ordering matching the PyTorch views:
#   input  features <-> multi-index (m_{k-1}, ..., m_0)   [m reversed]
#   output features <-> multi-index (n_0, ..., n_{l-1})
# Tiny (rank r ~ 2..8); done ONCE per weight/LoRA update in plain JAX (f32).
# ----------------------------------------------------------------------------
def build_tt_effective_weight(tt_cores, m_factors, n_factors):
    num_m, num_n = len(m_factors), len(n_factors)
    Fin = math.prod(m_factors)

    # m-side: A axes -> (r0=1, m_0, m_1, ..., m_{k-1}, r_k)
    A = tt_cores[0].astype(jnp.float32)
    for i in range(1, num_m):
        A = jnp.einsum('...r,rmp->...mp', A, tt_cores[i].astype(jnp.float32))
    A = A[0]                                               # (m_0, ..., m_{k-1}, r_k)
    perm = tuple(range(num_m - 1, -1, -1)) + (num_m,)      # reverse m axes
    A = jnp.transpose(A, perm).reshape(Fin, -1)            # (Fin, r_k)

    # n-side: C axes -> (r_k, n_0, ..., n_{l-1}, r_last=1)
    C = tt_cores[num_m].astype(jnp.float32)
    for i in range(1, num_n):
        C = jnp.einsum('...q,qnp->...np', C, tt_cores[num_m + i].astype(jnp.float32))
    C = C[..., 0]                                          # (r_k, n_0, ..., n_{l-1})
    C = C.reshape(C.shape[0], -1)                          # (r_k, Fout)

    return A @ C                                           # (Fin, Fout) f32


# ----------------------------------------------------------------------------
# Tiling helpers (all static Python — zero runtime cost under jit)
# ----------------------------------------------------------------------------
def _round_up(x, m):
    return ((x + m - 1) // m) * m


def _pad_dim(dim, candidates=(512, 256, 128), max_waste_frac=0.25):
    """Pad a lane (feature) dim to a multiple of 128, preferring a multiple of a
    larger tile if the extra zero padding is modest (avoids 128-wide tiles that
    underfeed the 256-wide MXU / multiply grid-step overhead)."""
    aligned = _round_up(dim, 128)
    for t in candidates:
        padded = _round_up(dim, t)
        if padded - aligned <= max_waste_frac * dim:
            return padded
    return aligned


def _lane_divisors(dim_p, cap):
    """Multiples of 128 that divide dim_p, descending, capped at `cap`."""
    n = dim_p // 128
    divs = [d * 128 for d in range(n, 0, -1) if n % d == 0 and d * 128 <= cap]
    return divs or [128]


def _choose_tiles(M, Fin_p, Fout_p, itemsize, vmem_budget=20 * 1024 * 1024):
    """Pick (TM, M_p, TK, TN). Big TM/TK cut weight re-streaming and accumulator
    vst traffic; the VMEM budget keeps the double-buffered working set v7x-safe."""
    sub = max(8, 32 // itemsize)           # dtype-aware sublane alignment

    M_aligned = _round_up(M, sub)
    if M_aligned <= 1024:
        TM, M_p = M_aligned, M_aligned
    else:
        TM, M_p = min(((t, _round_up(M, t)) for t in (1024, 512, 256)),
                      key=lambda tp: (tp[1] - M, -tp[0]))

    tn_opts = _lane_divisors(Fout_p, 512)
    tk_opts = _lane_divisors(Fin_p, 2048)
    TN, TK = tn_opts[0], tk_opts[0]

    def vmem_est(tm, tk, tn):
        # 2x double-buffered x tile + w tile + out tile, plus f32 acc scratch.
        return 2 * (tm * tk + tk * tn + tm * tn) * itemsize + tm * tn * 4

    ki, ni = 0, 0
    while vmem_est(TM, TK, TN) > vmem_budget:
        if ki + 1 < len(tk_opts):
            ki += 1
            TK = tk_opts[ki]
        elif ni + 1 < len(tn_opts):
            ni += 1
            TN = tn_opts[ni]
        elif TM > sub:
            TM = max(sub, _round_up(TM // 2, sub))
            M_p = _round_up(M, TM)
        else:
            break

    # Guarantee >=2 blocks along a parallel axis when possible so both of v7x's
    # TensorCores get work (neutral on single-core v5e/v6e).
    if (M_p // TM) * (Fout_p // TN) == 1:
        if Fout_p // 128 >= 2:
            for t in _lane_divisors(Fout_p, TN):
                if Fout_p // t >= 2:
                    TN = t
                    break
        elif M_aligned >= 2 * sub:
            TM = _round_up(-(-M_aligned // 2), sub)
            M_p = _round_up(M, TM)

    return TM, M_p, TK, TN


# ----------------------------------------------------------------------------
# Forward (per-call): pad x, run the fused GEMM kernel, slice.
# ----------------------------------------------------------------------------
def ttlora_forward(x, w_eff_p, bias_p, *, Fout):
    B, S, Fin = x.shape
    Fin_p, Fout_p = w_eff_p.shape
    compute_dtype = w_eff_p.dtype
    M = B * S

    TM, M_p, TK, TN = _choose_tiles(
        M, Fin_p, Fout_p, jnp.dtype(compute_dtype).itemsize
    )

    xm = x.reshape(M, Fin).astype(compute_dtype)
    if M_p != M or Fin_p != Fin:
        xm = jnp.pad(xm, ((0, M_p - M), (0, Fin_p - Fin)))

    grid = (M_p // TM, Fout_p // TN, Fin_p // TK)

    out = pl.pallas_call(
        ttlora_linear_kernel,
        out_shape=jax.ShapeDtypeStruct((M_p, Fout_p), x.dtype),
        grid=grid,
        in_specs=[
            pl.BlockSpec((TM, TK), lambda i, j, k: (i, k)),   # x tile
            pl.BlockSpec((TK, TN), lambda i, j, k: (k, j)),   # folded weight tile
            pl.BlockSpec((1, TN), lambda i, j, k: (0, j)),    # bias tile
        ],
        out_specs=pl.BlockSpec((TM, TN), lambda i, j, k: (i, j)),
        scratch_shapes=[pltpu.VMEM((TM, TN), jnp.float32)],
        compiler_params=pltpu.CompilerParams(
            dimension_semantics=("parallel", "parallel", "arbitrary"),
            vmem_limit_bytes=48 * 1024 * 1024,   # fits v7x's 64 MiB physical VMEM
        ),
    )(xm, w_eff_p, bias_p)

    return out[:M, :Fout].reshape(B, S, Fout)


# ----------------------------------------------------------------------------
# Module wrapper: weight fold / transpose / pad / cast done ONCE at init.
# ----------------------------------------------------------------------------
class TTLoRALinearContraction:
    def __init__(self, w_base, bias, tt_cores, m_factors, n_factors, alpha,
                 compute_dtype=None):
        Fout, Fin = w_base.shape
        assert Fin == math.prod(m_factors) and Fout == math.prod(n_factors)
        self.Fin, self.Fout = Fin, Fout
        # Keep the fold in f32 so the small LoRA delta isn't lost; only cast the
        # final operand matrix.  Pass compute_dtype=jnp.bfloat16 to run the MXU
        # in bf16 (3-4x MXU throughput) when accuracy allows.
        compute_dtype = compute_dtype or w_base.dtype

        w_tt = build_tt_effective_weight(tt_cores, m_factors, n_factors)  # (Fin, Fout) f32
        w_eff = jnp.transpose(w_base.astype(jnp.float32)) + float(alpha) * w_tt

        Fin_p = _pad_dim(Fin)
        Fout_p = _pad_dim(Fout)
        w_eff = jnp.pad(w_eff, ((0, Fin_p - Fin), (0, Fout_p - Fout)))
        self.w_eff = jax.device_put(w_eff.astype(compute_dtype))

        if bias is None:
            bias = jnp.zeros((Fout,), jnp.float32)
        bias2d = bias.astype(jnp.float32).reshape(1, Fout)
        self.bias_p = jax.device_put(jnp.pad(bias2d, ((0, 0), (0, Fout_p - Fout))))

        self._fwd = jax.jit(partial(ttlora_forward, Fout=Fout))

    def __call__(self, x):
        return self._fwd(x, self.w_eff, self.bias_p)


# ----------------------------------------------------------------------------
# Pure-JAX reference (direct transcription of tensorized_multiplication)
# ----------------------------------------------------------------------------
def tensorized_multiplication_ref(X, tt_cores, m_factors, n_factors):
    B, S = X.shape[0], X.shape[1]
    num_m, num_n = len(m_factors), len(n_factors)
    tt_state = X.reshape([B, S] + m_factors[::-1])[:, None]   # unsqueeze rank dim
    for i in range(num_m):
        tt_state = jnp.einsum('br...m,rmp->bp...', tt_state, tt_cores[i])
    for i in range(num_n):
        tt_state = jnp.einsum('br...,rnp->bp...n', tt_state, tt_cores[num_m + i])
    return tt_state.reshape(B, S, -1)


if __name__ == "__main__":
    key = jax.random.PRNGKey(0)

    # Small, consistent shapes: in_features = prod(m_factors) = 32,
    # out_features = prod(n_factors) = 32.
    B, S = 2, 8
    m_factors = [4, 8]
    n_factors = [8, 4]
    tt_shape = m_factors + n_factors            # [4, 8, 8, 4]
    tt_rank = [1, 2, 2, 2, 1]
    alpha = 4
    Fin, Fout = math.prod(m_factors), math.prod(n_factors)

    keys = jax.random.split(key, 3 + len(tt_shape))

    # base nn.Linear(in_features=Fin, out_features=Fout): weight (Fout, Fin), bias (Fout,)
    w_base = jax.random.normal(keys[0], (Fout, Fin), jnp.float32) * (1.0 / math.sqrt(Fin))
    bias = jax.random.normal(keys[1], (Fout,), jnp.float32) * 0.01
    x = jax.random.normal(keys[2], (B, S, Fin), jnp.float32)

    # 'direct_init'-style TT cores: uniform (kaiming-like) then Frobenius-norm normalized.
    tt_cores = []
    for i in range(len(tt_shape)):
        shape = (tt_rank[i], tt_shape[i], tt_rank[i + 1])
        bound = math.sqrt(6.0 / (shape[1] * shape[2])) / 3.0
        c = jax.random.uniform(keys[3 + i], shape, jnp.float32, -bound, bound)
        c = c / (jnp.linalg.norm(c) + 1e-6)
        tt_cores.append(c)

    # Prepare once (weight fold + pad cached), then forward.
    # TODO(synk): 'init_and_decompose' (TT-SVD of a dense delta) is init-time only
    # and has no kernel equivalent; only the forward pass is implemented.
    layer = TTLoRALinearContraction(w_base, bias, tt_cores, m_factors, n_factors, alpha)
    out = layer(x)
    out = jax.block_until_ready(out)

    # Reference: base_module(x) + alpha * tensorized_multiplication(x, ...)
    ref = (x @ w_base.T + bias
           + alpha * tensorized_multiplication_ref(x, tt_cores, m_factors, n_factors))

    assert out.shape == (B, S, Fout)
    assert jnp.allclose(out, ref, atol=2e-4, rtol=2e-4), "mismatch vs reference"
    print("KERNEL_OK")
</pallas_src>

<mosaic_0001>
module attributes {stable_mosaic.version = 11 : i64} {
  func.func @ttlora_linear_kernel(%arg0: i32, %arg1: i32, %arg2: i32, %arg3: memref<8x128xf32, #tpu.memory_space<vmem>>, %arg4: memref<128x128xf32, #tpu.memory_space<vmem>>, %arg5: memref<1x128xf32, #tpu.memory_space<vmem>>, %arg6: memref<8x128xf32, #tpu.memory_space<vmem>>, %arg7: memref<8x128xf32, #tpu.memory_space<vmem>>) attributes {dimension_semantics = [#tpu.dimension_semantics<parallel>, #tpu.dimension_semantics<parallel>, #tpu.dimension_semantics<arbitrary>], iteration_bounds = array<i64: 2, 1, 1>, scalar_prefetch = 0 : i64, scratch_operands = 1 : i64, tpu.core_type = #tpu.core_type<tc>, window_params = [{transform_indices = @transform_0, window_bounds = array<i64: 8, 128>}, {transform_indices = @transform_1, window_bounds = array<i64: 128, 128>}, {transform_indices = @transform_2, window_bounds = array<i64: 1, 128>}, {transform_indices = @transform_3, window_bounds = array<i64: 8, 128>}]} {
    %c0 = arith.constant 0 : index
    %c0_0 = arith.constant 0 : index
    %0 = vector.load %arg3[%c0, %c0_0] : memref<8x128xf32, #tpu.memory_space<vmem>>, vector<8x128xf32>
    %c0_1 = arith.constant 0 : index
    %c0_2 = arith.constant 0 : index
    %1 = vector.load %arg4[%c0_1, %c0_2] : memref<128x128xf32, #tpu.memory_space<vmem>>, vector<128x128xf32>
    %cst = arith.constant dense<0.000000e+00> : vector<8x128xf32>
    %2 = tpu.matmul %0, %1, %cst {dimension_numbers = #tpu.dot_dimension_numbers<[1], [0], [0], [1], [0, 0, 1, 1], [], []>} : vector<8x128xf32>, vector<128x128xf32>, vector<8x128xf32> -> vector<8x128xf32>
    %c0_i32 = arith.constant 0 : i32
    %3 = arith.cmpi eq, %arg2, %c0_i32 : i32
    %4 = arith.extui %3 : i1 to i32
    %c0_i32_3 = arith.constant 0 : i32
    %5 = arith.cmpi ne, %4, %c0_i32_3 : i32
    scf.if %5 {
      %c0_8 = arith.constant 0 : index
      %c0_9 = arith.constant 0 : index
      %12 = vector.load %arg7[%c0_8, %c0_9] : memref<8x128xf32, #tpu.memory_space<vmem>>, vector<8x128xf32>
      tpu.vector_store %arg7[%c0_8, %c0_9], %2 {strides = array<i32>} : memref<8x128xf32, #tpu.memory_space<vmem>>, vector<8x128xf32>,
    } else {
    }
    %c0_i32_4 = arith.constant 0 : i32
    %6 = arith.cmpi sgt, %arg2, %c0_i32_4 : i32
    %7 = arith.extui %6 : i1 to i32
    %c0_i32_5 = arith.constant 0 : i32
    %8 = arith.cmpi ne, %7, %c0_i32_5 : i32
    scf.if %8 {
      %c0_8 = arith.constant 0 : index
      %c0_9 = arith.constant 0 : index
      %12 = vector.load %arg7[%c0_8, %c0_9] : memref<8x128xf32, #tpu.memory_space<vmem>>, vector<8x128xf32>
      %13 = arith.addf %12, %2 : vector<8x128xf32>
      %c0_10 = arith.constant 0 : index
      %c0_11 = arith.constant 0 : index
      %14 = vector.load %arg7[%c0_10, %c0_11] : memref<8x128xf32, #tpu.memory_space<vmem>>, vector<8x128xf32>
      tpu.vector_store %arg7[%c0_10, %c0_11], %13 {strides = array<i32>} : memref<8x128xf32, #tpu.memory_space<vmem>>, vector<8x128xf32>,
    } else {
    }
    %c0_i32_6 = arith.constant 0 : i32
    %9 = arith.cmpi eq, %arg2, %c0_i32_6 : i32
    %10 = arith.extui %9 : i1 to i32
    %c0_i32_7 = arith.constant 0 : i32
    %11 = arith.cmpi ne, %10, %c0_i32_7 : i32
    scf.if %11 {
      %c0_8 = arith.constant 0 : index
      %c0_9 = arith.constant 0 : index
      %12 = vector.load %arg7[%c0_8, %c0_9] : memref<8x128xf32, #tpu.memory_space<vmem>>, vector<8x128xf32>
      %c0_10 = arith.constant 0 : index
      %c0_11 = arith.constant 0 : index
      %13 = vector.load %arg5[%c0_10, %c0_11] : memref<1x128xf32, #tpu.memory_space<vmem>>, vector<1x128xf32>
      %14 = vector.broadcast %13 : vector<1x128xf32> to vector<8x128xf32>
      %15 = arith.addf %12, %14 : vector<8x128xf32>
      %c0_12 = arith.constant 0 : index
      %c0_13 = arith.constant 0 : index
      %16 = vector.load %arg6[%c0_12, %c0_13] : memref<8x128xf32, #tpu.memory_space<vmem>>, vector<8x128xf32>
      tpu.vector_store %arg6[%c0_12, %c0_13], %15 {strides = array<i32>} : memref<8x128xf32, #tpu.memory_space<vmem>>, vector<8x128xf32>,
    } else {
    }
    return
  }
  func.func @transform_0(%arg0: i32, %arg1: i32, %arg2: i32) -> (i32, i32) {
    %c0_i32 = arith.constant 0 : i32
    return %arg0, %arg2 : i32, i32
  }
  func.func @transform_1(%arg0: i32, %arg1: i32, %arg2: i32) -> (i32, i32) {
    %c0_i32 = arith.constant 0 : i32
    return %arg2, %arg1 : i32, i32
  }
  func.func @transform_2(%arg0: i32, %arg1: i32, %arg2: i32) -> (i32, i32) {
    %c0_i32 = arith.constant 0 : i32
    %c0_i32_0 = arith.constant 0 : i32
    return %c0_i32, %arg1 : i32, i32
  }
  func.func @transform_3(%arg0: i32, %arg1: i32, %arg2: i32) -> (i32, i32) {
    %c0_i32 = arith.constant 0 : i32
    return %arg0, %arg1 : i32, i32
  }
}

</mosaic_0001>

<bundles_post_ra>
// kernel: ttlora_forward.1
= control target key start
LH: loop header
LB: loop body
LE: loop exit
PB: predicated region body
PF: predicated region fallthrough
CT: control target
= control target key end

     0   :  { %8 = vsyncpa [#allocation4], 0  ;;  %s674_s12 = smov 0   ;;  %s676_s13 = smov 0   ;;  %s753_s0 = inlined_call_operand.vmem [shape: f32[16,128], index: 0, kind: input, shape index: {}]   ;;  %s754_s1 = inlined_call_operand.hbm [shape: f32[128,128], index: 1, kind: input, shape index: {}]   ;;  %s755_s2 = inlined_call_operand.vmem [shape: f32[1,128], index: 2, kind: input, shape index: {}]   ;;  %s756_s3 = inlined_call_operand.vmem [shape: f32[16,128], index: 3, kind: output, shape index: {}]  }
   0x1   :  { %s678_s14 = smov 0  }
   0x2 LB: > { %s463_s15 = sadd.s32 4294967295, %s646_s14   ;;  %s33_s16 = sadd.s32 1, %s642_s13  ;;  %s646_s14 = sphi %s678_s14, %s14_s14   ;;  %s642_s13 = sphi %s676_s13, %s766_s13   ;;  %s638_s12 = sphi %s674_s12, %s765_s12  }
   0x3   : > { %p35_p0 = scmp.ge.s32.totalorder %s33_s16, 2  ;;  %p465_p1 = scmp.ge.s32.totalorder %s646_s14, 1 }
   0x4   : > { %p148_p2 = scmp.lt.s32.totalorder %s646_s14, 3  ;;  %p699_p4 = scmp.eq.s32.totalorder %s463_s15, 0 }
   0x5   : > { %s768_s16 = smov (%p35_p0, %s33_s16), 0  ;;  %s648_s19 = smov [#allocation3]  }
   0x6   : > { %p695_p3 = pnand %p465_p1, %p148_p2  ;;  %s164_s20 = sshll.u32 %s648_s19, 4  ;;  %s165_s20 = int_to_ptr.vmem [resolvable:$true] %s164_s20 }
   0x7   : > { %s761_s18 = scalar_select %p699_p4, 1, 0 }
   0x8   : > { %s760_s17 = scalar_select %p695_p3, 1, 0 }
   0x9   : > { %p556_p5 = pneg %p695_p3  ;;  %s592_s24 = scalar_lea.hbm %s754_s1, 2048 }
   0xa   : > { %p593_p7 = scmp.ne.s32.totalorder %s754_s1, %s592_s24  ;;  %p599_p11 = scmp.lt.u32.totalorder %s592_s24, %s754_s1 }
   0xb   : > { %p707_p6 = pnand %p699_p4, %p556_p5 }
   0xd   : > { %p594_p8 = pneg %p707_p6 }
   0xf   : > { %p595_p9 = pnand %p594_p8, %p593_p7 }
  0x11   : > { %p596_p10 = pneg %p595_p9 }
  0x13   : > { %p601_p12 = pnand %p599_p11, %p596_p10 }
  0x15   : > { %604 = shalt.err (!%p601_p12)
}
  0x16   : > { %s605_s29 = scalar_lea.vmem %s165_s20, 2048  ;;  %p613_p2 = scmp.lt.s32.totalorder %s165_s20, %s165_s20 }
  0x17   : > { %p606_p13 = scmp.ne.s32.totalorder %s165_s20, %s605_s29  ;;  %p614_p5 = scmp.lt.s32.totalorder %s605_s29, %s605_s29 }
  0x19   : > { %p608_p0 = pnand %p606_p13, %p594_p8  ;;  %p615_p4 = por %p614_p5, %p613_p2 }
  0x1b   : > { %p609_p1 = pneg %p608_p0 }
  0x1d   : > { %p616_p3 = pnand %p615_p4, %p609_p1 }
  0x1f   : > { %619 = shalt.err (!%p616_p3)
}
  0x20   : > { %s649_s30 = smov 128   ;;  %s650_s4 = smov 8  }
  0x21   : > { %559 = dma.hbm_to_vmem [thread:$0]  (!%p707_p6), %s754_s1, 2048, %s165_s20, [#allocation4], %s649_s30, %s649_s30, %s650_s4  }
  0x22   : > { %p763_p7 = scmp.ne.s32.totalorder %s760_s17, 0 }
  0x23   : > { %p764_p9 = scmp.ne.s32.totalorder (!%p763_p7), %s761_s18, 0 }
  0x24   : > { %196 = sbr.rel (%p763_p7) target bundleno = 294 (0x126), region = 32 }
  0x2b   : > { %633 = dma.done.wait (%p764_p9), [#allocation4], 2048  }
  0x2c   : > { %635 = vsyncadd (%p764_p9), [#allocation4], 4294965248  ;;  %v651_v0 = vmov 0.0|0.0   ;;  %vm652_vm0 = vmmov 0   ;;  %v653_v1 = vmov 0.0   ;;  %v246_v2 = vld [vmem:[#allocation3] sm:$0xff] }
  0x2d   : > { %528 = vmatprep.subr.bf16.mxu0 %v651_v0  ;;  %525 = vmatprep.mubr.msk.f32.mxu0 %vm652_vm0, %v653_v1  ;;  %v247_v3 = vld [vmem:[#allocation3 + $0x8] sm:$0xff]  ;;  %v248_v4 = vld [vmem:[#allocation3 + $0x10] sm:$0xff]  ;;  %v249_v6 = vld [vmem:[#allocation3 + $0x18] sm:$0xff]  ;;  %p227_p3 = scmp.lt.s32.totalorder %s638_s12, 1 }
  0x2e   : > { %v529_v5 = vpack.c.bf16 %v247_v3, %v246_v2  ;;  %v532_v7 = vpack.c.bf16 %v249_v6, %v248_v4  ;;  %v250_v8 = vld [vmem:[#allocation3 + $0x20] sm:$0xff]  ;;  %v251_v9 = vld [vmem:[#allocation3 + $0x28] sm:$0xff]  ;;  %v252_v11 = vld [vmem:[#allocation3 + $0x30] sm:$0xff] }
  0x2f   : > { %v535_v10 = vpack.c.bf16 %v251_v9, %v250_v8  ;;  %v253_v12 = vld [vmem:[#allocation3 + $0x38] sm:$0xff]  ;;  %v254_v14 = vld [vmem:[#allocation3 + $0x40] sm:$0xff]  ;;  %v255_v15 = vld [vmem:[#allocation3 + $0x48] sm:$0xff]  ;;  %s770_s12 = smov (!%p227_p3, %s638_s12), 1 }
  0x30   : > { %530 = vmatpush3.bf16.msra.mxu0 %v529_v5  ;;  %v538_v13 = vpack.c.bf16 %v253_v12, %v252_v11  ;;  %v541_v16 = vpack.c.bf16 %v255_v15, %v254_v14  ;;  %v256_v17 = vld [vmem:[#allocation3 + $0x50] sm:$0xff]  ;;  %v257_v18 = vld [vmem:[#allocation3 + $0x58] sm:$0xff]  ;;  %v258_v20 = vld [vmem:[#allocation3 + $0x60] sm:$0xff]  ;;  %s471_s7 = sshll.u32 %s770_s12, 3 }
  0x31   : > { %531 = vmatprep.subr.bf16.mxu0 %v651_v0  ;;  %v544_v19 = vpack.c.bf16 %v257_v18, %v256_v17  ;;  %v259_v21 = vld [vmem:[#allocation3 + $0x68] sm:$0xff]  ;;  %v260_v23 = vld [vmem:[#allocation3 + $0x70] sm:$0xff]  ;;  %v261_v24 = vld [vmem:[#allocation3 + $0x78] sm:$0xff]  ;;  %s233_s10 = scalar_lea.vmem %s753_s0, %s471_s7  ;;  %s244_s19 = scalar_lea.vmem %s756_s3, %s471_s7 }
  0x32   : > { %v547_v22 = vpack.c.bf16 %v259_v21, %v258_v20  ;;  %v550_v25 = vpack.c.bf16 %v261_v24, %v260_v23  ;;  %v245_v26 = vld [vmem:[%s233_s10] sm:$0xff] }
  0x33   : > { %v473_v27 = vld [vmem:[%s755_s2] ss:$0 sm:$0xff] }
  0x34   : > { %533 = vmatpush3.bf16.msra.mxu0 %v532_v7 }
  0x35   : > { %534 = vmatprep.subr.bf16.mxu0 %v651_v0 }
  0x38   : > { %536 = vmatpush3.bf16.msra.mxu0 %v535_v10 }
  0x39   : > { %537 = vmatprep.subr.bf16.mxu0 %v651_v0 }
  0x3c   : > { %539 = vmatpush3.bf16.msra.mxu0 %v538_v13 }
  0x3d   : > { %540 = vmatprep.subr.bf16.mxu0 %v651_v0 }
  0x40   : > { %542 = vmatpush3.bf16.msra.mxu0 %v541_v16 }
  0x41   : > { %543 = vmatprep.subr.bf16.mxu0 %v651_v0 }
  0x44   : > { %545 = vmatpush3.bf16.msra.mxu0 %v544_v19 }
  0x45   : > { %546 = vmatprep.subr.bf16.mxu0 %v651_v0 }
  0x48   : > { %548 = vmatpush3.bf16.msra.mxu0 %v547_v22 }
  0x49   : > { %549 = vmatprep.subr.bf16.mxu0 %v651_v0 }
  0x4c   : > { %551 = vmatpush3.bf16.msra.mxu0 %v550_v25 }
  0x4f   : > { %526 = vmatmul.mubr.f32.vlgmr.msra.gmra.mrb[0].mxu0 %v245_v26 }
 0x122   : > { %v328_v28 = vpop.f32.mrb[0].mxu0 }
 0x123   : > { %v355_v29 = vadd.f32 %v473_v27, %v328_v28  ;;  %v527_v30 = vpop.f32.mrb[1].mxu0 }
 0x125   : > { %356 = vst [vmem:[%s244_s19] sm:$0xff] %v355_v29 }
 0x126 PF: > { %s14_s14 = sadd.s32 1, %s646_s14   ;;  %s765_s12 = smov %s642_s13 }
 0x127   : > { %p11_p4 = scmp.ge.s32.totalorder %s14_s14, 4   ;;  %s766_s13 = smov %s768_s16 }
 0x129   :  { %13 = sbr.rel (!%p11_p4) target bundleno = 2 (0x2), region = 83 }
 0x130   :  { %382 = vsyncpa [#allocation4], 1 }
 0x131   :  { %384 = vsyncpa [#allocation4 + $0x1], 1 }

</bundles_post_ra>
